<compile_context>
chip_gen: v6e
topology: v6e:2x2x1
jax: 0.10.0
libtpu: 0.0.40
codegen_flags: <defaults>
</compile_context>

<pallas_src>
import functools

import jax
import jax.numpy as jnp
from jax import lax
from jax.experimental import pallas as pl
from jax.experimental.pallas import tpu as pltpu


def _round_up(x: int, m: int) -> int:
    return ((x + m - 1) // m) * m


def _tpu_plan() -> dict:
    """Generation-aware targets: cores to use, pipeline VMEM budget, VMEM cap."""
    kind = ""
    try:
        kind = jax.devices()[0].device_kind.lower()
    except Exception:  # defensive: fall back to conservative defaults
        pass
    if "v7" in kind:
        # 2 TensorCores/chip but only 64 MiB VMEM per core: split the batch
        # across cores, keep the per-core pipeline footprint modest.
        return dict(num_cores=2, pipeline_budget=20 << 20, vmem_cap=44 << 20)
    if "v6" in kind:
        # Single TC, 128 MiB physical VMEM, ~1.4 TB/s HBM: push big blocks.
        return dict(num_cores=1, pipeline_budget=48 << 20, vmem_cap=96 << 20)
    # v5e / unknown: ~0.82 TB/s HBM already saturates with ~4-8 MiB blocks.
    return dict(num_cores=1, pipeline_budget=24 << 20, vmem_cap=64 << 20)


def _pick_tile_rows(batch: int, dim: int, itemsize: int, pipeline_budget: int,
                    row_align: int, num_cores: int, max_rows: int = 8192) -> int:
    """Rows per tile sized so the whole double-buffered pipeline fits the budget."""
    lane_dim = _round_up(dim, 128)
    # VMEM bytes per tile row:
    #   2 embedding inputs x 2 pipeline buffers (lane-padded to 128)
    # + 2 buffers of the (tile_b, 1) label block (lane-padded f32)
    # + the (tile_b, 1) f32 accumulator scratch.
    per_row = 4 * lane_dim * itemsize + 3 * 128 * 4
    rows = (pipeline_budget // max(1, per_row)) // row_align * row_align
    rows = max(row_align, min(rows, max_rows))
    # Balance the per-core slices: no tile needs to exceed ceil(B / cores).
    per_core_cap = _round_up(pl.cdiv(batch, max(1, num_cores)), row_align)
    return int(min(rows, per_core_cap))


def _contrastive_kernel(e1_ref, e2_ref, lbl_ref, out_ref, acc_ref, *,
                        margin: float, batch: int, tile_b: int,
                        tiles_per_core: int, first_padded_tile: int,
                        needs_mask: bool):
    c = pl.program_id(0)   # TensorCore slice ("parallel")
    i = pl.program_id(1)   # reduction step within the slice ("arbitrary")

    @pl.when(i == 0)
    def _init():
        acc_ref[...] = jnp.zeros_like(acc_ref)

    # Inputs stay in their wire dtype (e.g. bf16) and are upcast here.
    e1 = e1_ref[...].astype(jnp.float32)              # (tile_b, D)
    e2 = e2_ref[...].astype(jnp.float32)              # (tile_b, D)
    lbl = lbl_ref[...].astype(jnp.float32)            # (tile_b, 1)

    diff = e1 - e2
    sq_dist = jnp.sum(diff * diff, axis=1, keepdims=True)   # (tile_b, 1)
    dist = jnp.sqrt(sq_dist)                                 # margin branch only
    clamped = jnp.maximum(margin - dist, 0.0)
    per_row = lbl * sq_dist + (1.0 - lbl) * (clamped * clamped)

    if needs_mask:
        # Only tiles at/after `first_padded_tile` can contain padded rows
        # (ragged tail or clamped overshoot tiles of the core split).
        t = c * tiles_per_core + i                     # logical (unclamped) tile id

        @pl.when(t < first_padded_tile)
        def _acc_full():
            acc_ref[...] += per_row

        @pl.when(t >= first_padded_tile)
        def _acc_masked():
            row_idx = t * tile_b + lax.broadcasted_iota(jnp.int32, (tile_b, 1), 0)
            acc_ref[...] += jnp.where(row_idx < batch, per_row, 0.0)
    else:
        acc_ref[...] += per_row

    # Single cross-lane reduce + output store, once per core slice.
    @pl.when(i == tiles_per_core - 1)
    def _finalize():
        total = jnp.sum(acc_ref[...])
        out_ref[...] = jnp.zeros(out_ref.shape, jnp.float32) + total


def contrastive_loss(embd_1, embd_2, label, margin: float = 1.0,
                     tile_b: int | None = None, num_cores: int | None = None):
    if margin <= 0:
        raise ValueError("Margin must be a positive number.")
    B, D = embd_1.shape

    if label.dtype == jnp.bool_:
        label = label.astype(jnp.float32)
    label2d = label.reshape(B, 1)                     # tiny; upcast happens in-kernel

    plan = _tpu_plan()
    if num_cores is None:
        num_cores = plan["num_cores"]

    itemsize = jnp.dtype(embd_1.dtype).itemsize
    row_align = max(8, 32 // max(1, itemsize))        # f32: 8, bf16: 16, int8/fp8: 32
    if tile_b is None:
        tile_b = _pick_tile_rows(B, D, itemsize, plan["pipeline_budget"],
                                 row_align, num_cores)
    else:
        tile_b = max(row_align, _round_up(int(tile_b), row_align))
    if tile_b >= B:
        # One tile covers the whole batch: a full-array block is always legal
        # regardless of dtype packing, and the grid degenerates to (1, 1).
        tile_b = B

    total_tiles = pl.cdiv(B, tile_b)
    num_cores = max(1, min(num_cores, total_tiles))
    tiles_per_core = pl.cdiv(total_tiles, num_cores)
    padded_rows = num_cores * tiles_per_core * tile_b
    needs_mask = padded_rows != B
    first_padded_tile = B // tile_b                   # first tile containing rows >= B
    clamp_needed = num_cores * tiles_per_core > total_tiles

    def tile_index(c, i):
        t = c * tiles_per_core + i
        if clamp_needed:                              # keep overshoot tiles in bounds
            t = jnp.minimum(t, total_tiles - 1)
        return (t, 0)

    # Scoped-VMEM request sized to the actual pipeline footprint (+ headroom).
    lane_d = _round_up(D, 128)
    emb_block_bytes = tile_b * lane_d * itemsize
    col_block_bytes = tile_b * 128 * 4                # lane-padded (tile_b, 1) f32
    footprint = 4 * emb_block_bytes + 3 * col_block_bytes
    vmem_limit = int(min(plan["vmem_cap"],
                         max(32 << 20, footprint * 3 // 2 + (4 << 20))))

    kernel = functools.partial(
        _contrastive_kernel, margin=float(margin), batch=B, tile_b=tile_b,
        tiles_per_core=tiles_per_core, first_padded_tile=first_padded_tile,
        needs_mask=needs_mask)

    cost = pl.CostEstimate(
        flops=3 * B * D + 8 * B,
        transcendentals=B,                            # one sqrt per row
        bytes_accessed=(2 * B * D * itemsize + B * label2d.dtype.itemsize
                        + num_cores * 8 * 128 * 4),
    )

    partials = pl.pallas_call(
        kernel,
        out_shape=jax.ShapeDtypeStruct((num_cores, 8, 128), jnp.float32),
        grid_spec=pltpu.PrefetchScalarGridSpec(
            num_scalar_prefetch=0,
            grid=(num_cores, tiles_per_core),
            in_specs=[
                pl.BlockSpec((tile_b, D), tile_index),
                pl.BlockSpec((tile_b, D), tile_index),
                pl.BlockSpec((tile_b, 1), tile_index),
            ],
            # One tile-aligned partial-sum block per core slice; blocks are
            # disjoint across the parallel axis (safe on v7x's two TCs).
            out_specs=pl.BlockSpec((1, 8, 128), lambda c, i: (c, 0, 0)),
            scratch_shapes=[pltpu.VMEM((tile_b, 1), jnp.float32)],
        ),
        compiler_params=pltpu.CompilerParams(
            dimension_semantics=("parallel", "arbitrary"),
            vmem_limit_bytes=vmem_limit,
        ),
        cost_estimate=cost,
    )(embd_1, embd_2, label2d)

    # Combine per-core partial sums and take the batch mean on the host side.
    return jnp.sum(partials[:, 0, 0]) / B


def _reference_loss(embd_1, embd_2, label, margin: float = 1.0):
    label = label.astype(jnp.float32)
    e1 = embd_1.astype(jnp.float32)
    e2 = embd_2.astype(jnp.float32)
    d = jnp.linalg.norm(e1 - e2, axis=1)
    loss_sim = label * d ** 2
    loss_dis = (1.0 - label) * jnp.maximum(margin - d, 0.0) ** 2
    return jnp.mean(loss_sim + loss_dis)


if __name__ == "__main__":
    root = jax.random.PRNGKey(0)
    k1, k2, k3, k4, k5, k6 = jax.random.split(root, 6)

    # Test 1: small f32 case matching the module's documented shapes.
    batch, embed_dim = 8, 32
    e1 = jax.random.normal(k1, (batch, embed_dim), dtype=jnp.float32)
    e2 = jax.random.normal(k2, (batch, embed_dim), dtype=jnp.float32)
    lab = jax.random.bernoulli(k3, p=0.5, shape=(batch,)).astype(jnp.float32)

    loss = jax.block_until_ready(contrastive_loss(e1, e2, lab, margin=1.0))
    ref = _reference_loss(e1, e2, lab, margin=1.0)
    assert jnp.allclose(loss, ref, rtol=1e-5, atol=1e-5), (loss, ref)

    # Test 2: multi-tile grid with a ragged tail (B=20, TB=8 -> 3 tiles).
    b2, d2 = 20, 32
    a1 = jax.random.normal(k4, (b2, d2), dtype=jnp.float32)
    a2 = jax.random.normal(k5, (b2, d2), dtype=jnp.float32)
    lab2 = jax.random.bernoulli(k6, p=0.5, shape=(b2,)).astype(jnp.float32)

    loss2 = jax.block_until_ready(contrastive_loss(a1, a2, lab2, margin=1.0, tile_b=8))
    ref2 = _reference_loss(a1, a2, lab2, margin=1.0)
    assert jnp.allclose(loss2, ref2, rtol=1e-5, atol=1e-5), (loss2, ref2)

    # Test 3: v7x-style two-core split (leading parallel axis, per-core partial
    # sums, clamped overshoot tiles); also correct on single-TC chips.
    loss3 = jax.block_until_ready(
        contrastive_loss(a1, a2, lab2, margin=1.0, tile_b=8, num_cores=2))
    assert jnp.allclose(loss3, ref2, rtol=1e-5, atol=1e-5), (loss3, ref2)

    # Test 4: bf16 embeddings stay bf16 on the wire; kernel upcasts internally.
    e1b, e2b = e1.astype(jnp.bfloat16), e2.astype(jnp.bfloat16)
    loss4 = jax.block_until_ready(contrastive_loss(e1b, e2b, lab, margin=1.0))
    ref4 = _reference_loss(e1b, e2b, lab, margin=1.0)
    assert jnp.allclose(loss4, ref4, rtol=1e-3, atol=1e-3), (loss4, ref4)

    print("KERNEL_OK")
</pallas_src>

<mosaic_0001>
module attributes {stable_mosaic.version = 11 : i64} {
  func.func @_contrastive_kernel(%arg0: i32, %arg1: i32, %arg2: memref<8x32xf32, #tpu.memory_space<vmem>>, %arg3: memref<8x32xf32, #tpu.memory_space<vmem>>, %arg4: memref<8x1xf32, #tpu.memory_space<vmem>>, %arg5: memref<1x8x128xf32, #tpu.memory_space<vmem>>, %arg6: memref<8x1xf32, #tpu.memory_space<vmem>>) attributes {dimension_semantics = [#tpu.dimension_semantics<parallel>, #tpu.dimension_semantics<arbitrary>], iteration_bounds = array<i64: 1, 1>, scalar_prefetch = 0 : i64, scratch_operands = 1 : i64, tpu.core_type = #tpu.core_type<tc>, window_params = [{transform_indices = @transform_0, window_bounds = array<i64: 8, 32>}, {transform_indices = @transform_1, window_bounds = array<i64: 8, 32>}, {transform_indices = @transform_2, window_bounds = array<i64: 8, 1>}, {transform_indices = @transform_3, window_bounds = array<i64: 1, 8, 128>}]} {
    %c0_i32 = arith.constant 0 : i32
    %0 = arith.cmpi eq, %arg1, %c0_i32 : i32
    %1 = arith.extui %0 : i1 to i32
    %c0_i32_0 = arith.constant 0 : i32
    %2 = arith.cmpi ne, %1, %c0_i32_0 : i32
    scf.if %2 {
      %cst_15 = arith.constant 0.000000e+00 : f32
      %27 = vector.broadcast %cst_15 : f32 to vector<8x1xf32>
      %c0_16 = arith.constant 0 : index
      %c0_17 = arith.constant 0 : index
      %28 = vector.load %arg6[%c0_16, %c0_17] : memref<8x1xf32, #tpu.memory_space<vmem>>, vector<8x1xf32>
      tpu.vector_store %arg6[%c0_16, %c0_17], %27 {strides = array<i32>} : memref<8x1xf32, #tpu.memory_space<vmem>>, vector<8x1xf32>,
    } else {
    }
    %c0 = arith.constant 0 : index
    %c0_1 = arith.constant 0 : index
    %3 = vector.load %arg2[%c0, %c0_1] : memref<8x32xf32, #tpu.memory_space<vmem>>, vector<8x32xf32>
    %c0_2 = arith.constant 0 : index
    %c0_3 = arith.constant 0 : index
    %4 = vector.load %arg3[%c0_2, %c0_3] : memref<8x32xf32, #tpu.memory_space<vmem>>, vector<8x32xf32>
    %c0_4 = arith.constant 0 : index
    %c0_5 = arith.constant 0 : index
    %5 = vector.load %arg4[%c0_4, %c0_5] : memref<8x1xf32, #tpu.memory_space<vmem>>, vector<8x1xf32>
    %6 = arith.subf %3, %4 : vector<8x32xf32>
    %7 = arith.mulf %6, %6 : vector<8x32xf32>
    %cst = arith.constant dense<0.000000e+00> : vector<8xf32>
    %8 = vector.multi_reduction <add>, %7, %cst [1] : vector<8x32xf32> to vector<8xf32>
    %9 = vector.shape_cast %8 : vector<8xf32> to vector<8x1xf32>
    %10 = math.sqrt %9 : vector<8x1xf32>
    %cst_6 = arith.constant 1.000000e+00 : f32
    %11 = vector.broadcast %cst_6 : f32 to vector<8x1xf32>
    %12 = arith.subf %11, %10 : vector<8x1xf32>
    %cst_7 = arith.constant 0.000000e+00 : f32
    %13 = vector.broadcast %cst_7 : f32 to vector<8x1xf32>
    %14 = arith.maximumf %12, %13 : vector<8x1xf32>
    %15 = arith.mulf %5, %9 : vector<8x1xf32>
    %cst_8 = arith.constant 1.000000e+00 : f32
    %16 = vector.broadcast %cst_8 : f32 to vector<8x1xf32>
    %17 = arith.subf %16, %5 : vector<8x1xf32>
    %18 = arith.mulf %14, %14 : vector<8x1xf32>
    %19 = arith.mulf %17, %18 : vector<8x1xf32>
    %20 = arith.addf %15, %19 : vector<8x1xf32>
    %c0_9 = arith.constant 0 : index
    %c0_10 = arith.constant 0 : index
    %21 = vector.load %arg6[%c0_9, %c0_10] : memref<8x1xf32, #tpu.memory_space<vmem>>, vector<8x1xf32>
    %22 = arith.addf %21, %20 : vector<8x1xf32>
    %c0_11 = arith.constant 0 : index
    %c0_12 = arith.constant 0 : index
    %23 = vector.load %arg6[%c0_11, %c0_12] : memref<8x1xf32, #tpu.memory_space<vmem>>, vector<8x1xf32>
    tpu.vector_store %arg6[%c0_11, %c0_12], %22 {strides = array<i32>} : memref<8x1xf32, #tpu.memory_space<vmem>>, vector<8x1xf32>,
    %c0_i32_13 = arith.constant 0 : i32
    %24 = arith.cmpi eq, %arg1, %c0_i32_13 : i32
    %25 = arith.extui %24 : i1 to i32
    %c0_i32_14 = arith.constant 0 : i32
    %26 = arith.cmpi ne, %25, %c0_i32_14 : i32
    scf.if %26 {
      %c0_15 = arith.constant 0 : index
      %c0_16 = arith.constant 0 : index
      %27 = vector.load %arg6[%c0_15, %c0_16] : memref<8x1xf32, #tpu.memory_space<vmem>>, vector<8x1xf32>
      %28 = vector.shape_cast %27 : vector<8x1xf32> to vector<1x8x1xf32>
      %cst_17 = arith.constant dense<0.000000e+00> : vector<1xf32>
      %29 = vector.multi_reduction <add>, %28, %cst_17 [1, 2] : vector<1x8x1xf32> to vector<1xf32>
      %30 = vector.shape_cast %29 : vector<1xf32> to vector<1x1x1xf32>
      %31 = vector.extract %30[0, 0, 0] : f32 from vector<1x1x1xf32>
      %cst_18 = arith.constant 0.000000e+00 : f32
      %32 = vector.broadcast %cst_18 : f32 to vector<1x8x128xf32>
      %33 = vector.broadcast %31 : f32 to vector<1x8x128xf32>
      %34 = arith.addf %32, %33 : vector<1x8x128xf32>
      %c0_19 = arith.constant 0 : index
      %c0_20 = arith.constant 0 : index
      %c0_21 = arith.constant 0 : index
      %35 = vector.load %arg5[%c0_19, %c0_20, %c0_21] : memref<1x8x128xf32, #tpu.memory_space<vmem>>, vector<1x8x128xf32>
      tpu.vector_store %arg5[%c0_19, %c0_20, %c0_21], %34 {strides = array<i32>} : memref<1x8x128xf32, #tpu.memory_space<vmem>>, vector<1x8x128xf32>,
    } else {
    }
    return
  }
  func.func @transform_0(%arg0: i32, %arg1: i32) -> (i32, i32) {
    %c1_i32 = arith.constant 1 : i32
    %0 = arith.muli %arg0, %c1_i32 : i32
    %1 = arith.addi %0, %arg1 : i32
    %c0_i32 = arith.constant 0 : i32
    %c0_i32_0 = arith.constant 0 : i32
    return %1, %c0_i32 : i32, i32
  }
  func.func @transform_1(%arg0: i32, %arg1: i32) -> (i32, i32) {
    %c1_i32 = arith.constant 1 : i32
    %0 = arith.muli %arg0, %c1_i32 : i32
    %1 = arith.addi %0, %arg1 : i32
    %c0_i32 = arith.constant 0 : i32
    %c0_i32_0 = arith.constant 0 : i32
    return %1, %c0_i32 : i32, i32
  }
  func.func @transform_2(%arg0: i32, %arg1: i32) -> (i32, i32) {
    %c1_i32 = arith.constant 1 : i32
    %0 = arith.muli %arg0, %c1_i32 : i32
    %1 = arith.addi %0, %arg1 : i32
    %c0_i32 = arith.constant 0 : i32
    %c0_i32_0 = arith.constant 0 : i32
    return %1, %c0_i32 : i32, i32
  }
  func.func @transform_3(%arg0: i32, %arg1: i32) -> (i32, i32, i32) {
    %c0_i32 = arith.constant 0 : i32
    %c0_i32_0 = arith.constant 0 : i32
    %c0_i32_1 = arith.constant 0 : i32
    return %arg0, %c0_i32, %c0_i32_0 : i32, i32, i32
  }
}

</mosaic_0001>

<bundles_post_ra>
// kernel: tpu_custom_call.1
= control target key start
LH: loop header
LB: loop body
LE: loop exit
PB: predicated region body
PF: predicated region fallthrough
CT: control target
= control target key end

     0   :  { %8 = vsyncpa [#allocation4], 0  ;;  %s231_s0 = inlined_call_operand.vmem [shape: f32[8,32], index: 0, kind: input, shape index: {}]   ;;  %s232_s1 = inlined_call_operand.hbm [shape: f32[8,32], index: 1, kind: input, shape index: {}]   ;;  %s233_s2 = inlined_call_operand.vmem [shape: f32[8,1], index: 2, kind: input, shape index: {}]   ;;  %s234_s3 = inlined_call_operand.hbm [shape: f32[1,8,128], index: 3, kind: output, shape index: {}]  }
   0x1   :  { %9 = vsyncpa [#allocation5], 0  ;;  %s193_s12 = smov [#allocation3]  }
   0x2   :  { %s27_s13 = sshll.u32 %s193_s12, 4  ;;  %s28_s13 = int_to_ptr.vmem [resolvable:$true] %s27_s13 }
   0x3   :  { %s157_s14 = scalar_lea.vmem %s28_s13, 128  ;;  %p162_p1 = scmp.lt.s32.totalorder %s28_s13, %s28_s13 }
   0x4   :  { %p158_p0 = scmp.ne.s32.totalorder %s28_s13, %s157_s14  ;;  %p163_p2 = scmp.lt.s32.totalorder %s157_s14, %s157_s14 }
   0x6   :  { %p164_p3 = por %p163_p2, %p162_p1 }
   0x8   :  { %p165_p4 = pnand %p164_p3, %p158_p0 }
   0xa   :  { %168 = shalt.err (!%p165_p4)
}
   0xb   :  { %30 = dma.hbm_to_vmem [thread:$0]  %s232_s1, 128, %s28_s13, [#allocation4]  }
   0xc   :  { %189 = dma.done.wait [#allocation4], 128  }
   0xd   :  { %190 = vsyncadd [#allocation4], 4294967168  ;;  %v71_v0 = vld [vmem:[%s231_s0] sm:$0xff]  ;;  %v72_v1 = vld [vmem:[#allocation3] sm:$0xff]  ;;  %vm76_vm0 = vcmask 261120   ;;  %vm69_vm1 = vcmask 7168  }
   0xe   :  { %v74_v2 = vsub.f32 %v71_v0, %v72_v1  ;;  %v194_v5 = vmov 0.0   ;;  %v73_v13 = vld [vmem:[%s233_s2] sm:$0xff]  ;;  %s195_s2 = smov [#allocation6]  }
   0xf   :  { %70 = vst.msk [vmem:[#allocation2] sm:$0xff] %vm69_vm1, %v194_v5  ;;  %v90_v14 = vsub.f32 1.0, %v73_v13  ;;  %s121_s19 = sshll.u32 %s195_s2, 4  ;;  %s122_s19 = int_to_ptr.vmem [resolvable:$true] %s121_s19 }
  0x10   :  { %v75_v3 = vmul.f32 %v74_v2, %v74_v2  ;;  %s169_s21 = scalar_lea.vmem %s122_s19, 128  ;;  %p174_p6 = scmp.lt.s32.totalorder %s122_s19, %s122_s19 }
  0x11   :  { %p170_p5 = scmp.ne.s32.totalorder %s122_s19, %s169_s21  ;;  %p175_p7 = scmp.lt.s32.totalorder %s169_s21, %s169_s21 }
  0x12   :  { %v77_v4 = vsel %vm76_vm0, %v75_v3, 0.0 }
  0x13   :  { %78 = vadd.xlane.f32.xlu0 %v77_v4  ;;  %p176_p8 = por %p175_p7, %p174_p6 }
  0x15   :  { %p177_p9 = pnand %p176_p8, %p170_p5 }
  0x16   :  { %v94_v19 = vld [vmem:[#allocation2] sm:$0xff] }
  0x9c   :  { %v79_v6 = vpop.xlane.xlu0 %78 }
  0x9d   :  { %147 = vrsqrt.f32 %v79_v6  ;;  %vm82_vm2 = vcmp.eq.f32.partialorder %v79_v6, inf  ;;  %v85_v9 = vand.u32 2147483648, %v79_v6  ;;  %vm84_vm3 = vcmp.eq.f32.partialorder %v79_v6, 0.0 }
  0x9e   :  { %v89_v17 = vmul.f32 %v79_v6, %v73_v13 }
  0xaa   :  { %v148_v7 = vpop.eup %147 }
  0xab   :  { %v81_v8 = vmul.f32 %v148_v7, %v79_v6 }
  0xad   :  { %v83_v10 = vsel %vm82_vm2, %v79_v6, %v81_v8 }
  0xae   :  { %v86_v11 = vsel %vm84_vm3, %v85_v9, %v83_v10 }
  0xaf   :  { %v87_v12 = vsub.f32 1.0, %v86_v11 }
  0xb1   :  { %v88_v15 = vmax.f32 %v87_v12, 0.0 }
  0xb3   :  { %v91_v16 = vmul.f32 %v88_v15, %v88_v15 }
  0xb5   :  { %v92_v18 = vmul.f32 %v91_v16, %v90_v14 }
  0xb7   :  { %v93_v20 = vadd.f32 %v92_v18, %v89_v17 }
  0xb9   :  { %v95_v21 = vadd.f32 %v94_v19, %v93_v20 }
  0xbb   :  { %97 = vst.msk [vmem:[#allocation2] sm:$0xff] %vm69_vm1, %v95_v21 }
  0xc2   :  { %v101_v22 = vld [vmem:[#allocation2] sm:$0xff] }
  0xc3   :  { %v102_v23 = vsel %vm69_vm1, %v101_v22, 0.0 }
  0xc4   :  { %103 = vadd.xlane.f32.xlu0 %v102_v23 }
 0x14d   :  { %v104_v24 = vpop.xlane.xlu0 %103 }
 0x14e   :  { %v105_v25 = vrot.slane %v104_v24, 4 }
 0x150   :  { %v106_v26 = vadd.f32 %v105_v25, %v104_v24 }
 0x152   :  { %v107_v27 = vrot.slane %v106_v26, 2 }
 0x154   :  { %v108_v28 = vadd.f32 %v107_v27, %v106_v26 }
 0x156   :  { %v109_v29 = vrot.slane %v108_v28, 1 }
 0x158   :  { %v110_v30 = vadd.f32 %v109_v29, %v108_v28 }
 0x15a   :  { %142 = vpush %v110_v30 }
 0x18b   :  { %s143_s20 = spop %142 }
 0x18c   :  { %v112_v31 = vstv %s143_s20 }
 0x18d   :  { %114 = vst [vmem:[#allocation6] sm:$0xff] %v112_v31 }
 0x18e   :  { %180 = shalt.err (!%p177_p9)
}
 0x18f   :  { %124 = dma.vmem_to_hbm [thread:$0]  %s122_s19, 128, %s234_s3, [#allocation5]  }
 0x190   :  { %191 = dma.done.wait [#allocation5], 128  }
 0x191   :  { %192 = vsyncadd [#allocation5], 4294967168 }
 0x192   :  { %128 = vsyncpa [#allocation4], 1 }
 0x193   :  { %129 = vsyncpa [#allocation5], 1 }

</bundles_post_ra>
